<compile_context>
chip_gen: v6e
topology: v6e:2x2x1
jax: 0.10.0
libtpu: 0.0.40
codegen_flags: <defaults>
</compile_context>

<pallas_src>
import jax
import jax.numpy as jnp
from jax.experimental import pallas as pl
from jax.experimental.pallas import tpu as pltpu


def _btm_latent_kernel(x_ref, av_ref, wlat_t_ref, wnl_ref, o_ref):
    # x_ref:      (TB, D)  input rows (streamed, double-buffered)
    # av_ref:     (TB, D)  author vectors for the same rows (streamed)
    # wlat_t_ref: (D, D)   latentW.weight^T (VMEM-resident across grid steps)
    # wnl_ref:    (1, D)   non_latentW.weight, lane-dense
    # o_ref:      (1, TB)  lane-dense output block
    x = x_ref[...]
    av = av_ref[...]

    # Latent matmul on the MXU, f32 accumulate: z = x @ W_latent^T.
    z = jnp.dot(x, wlat_t_ref[...], preferred_element_type=jnp.float32)  # (TB, D)

    # Fused term: out_row = sum_d( av*z + x*wnl )
    #           == (x @ wnl^T) + sum(av * (x @ WlatT), axis=-1)
    # Single VPU FMA chain + a single XLU lane reduce per row.
    fused = av * z + x * wnl_ref[...]
    r = jnp.sum(fused, axis=-1)                       # (TB,)

    # Lane-dense store.
    o_ref[...] = r.reshape(o_ref.shape).astype(o_ref.dtype)


def _round_up(a, m):
    return -(-a // m) * m


def btm_latent_forward(x, author_v, w_latent_t, w_non_latent, *,
                       max_tb=1024, vmem_budget=48 << 20):
    """BTMlatent forward pass.

    Args:
        x:            (B, D) float32 inputs.
        author_v:     (B, D) float32 author vectors (already gathered by id).
        w_latent_t:   (D, D) float32 = latentW.weight.T (pre-transposed ONCE at
                      model setup, hoisted out of the per-call path).
        w_non_latent: (1, D) float32, torch non_latentW.weight layout.
        max_tb:       max batch-tile size (rows per grid step).
        vmem_budget:  VMEM budget used to derive the tile size (conservative so
                      it also fits v7x's 64 MiB physical VMEM).

    Returns:
        (B, 1) float32, matching
        non_latentW(x) + (author_v * latentW(x)).sum(dim=1, keepdim=True).
        (Both torch Linears use bias=False, so no bias terms.)
    """
    B, D = x.shape
    itemsize = 4

    # --- derive the batch tile from the VMEM budget ---------------------------
    # Resident weights (BlockSpec double-buffers them even with a constant block
    # index) + lane-padded (1, D) weight.
    weight_bytes = 2 * D * D * itemsize + 2 * _round_up(D, 128) * itemsize
    # Per batch-row cost: x + author_v double-buffered, plus the output lane.
    per_row = 2 * 2 * D * itemsize + 2 * itemsize
    avail = max(vmem_budget - weight_bytes - (1 << 20), per_row * 128)
    tb_cap = max(128, min(max_tb, avail // per_row))

    if B <= tb_cap:
        TB = _round_up(B, 8)          # single tile; round tiny batches to sublanes
        num_tiles = 1
    else:
        TB = (tb_cap // 128) * 128    # multiple of 128 -> lane-dense output blocks
        num_tiles = -(-B // TB)       # ragged last tile: Pallas partial-block
                                      # padding, NO wrapper-side jnp.pad copy
    Bp = num_tiles * TB

    # VMEM limit: actual need with headroom, capped below v7x physical (64 MiB).
    vmem_need = weight_bytes + per_row * TB
    vmem_limit = int(min(max(2 * vmem_need, 16 << 20), 48 << 20))

    cost = pl.CostEstimate(
        flops=2 * Bp * D * D + 4 * Bp * D,
        transcendentals=0,
        bytes_accessed=2 * B * D * itemsize + D * D * itemsize
        + D * itemsize + B * itemsize,
    )

    out = pl.pallas_call(
        _btm_latent_kernel,
        out_shape=jax.ShapeDtypeStruct((1, Bp), jnp.float32),
        grid_spec=pltpu.PrefetchScalarGridSpec(
            num_scalar_prefetch=0,
            grid=(num_tiles,),
            in_specs=[
                pl.BlockSpec((TB, D), lambda i: (i, 0)),   # x tile (streamed)
                pl.BlockSpec((TB, D), lambda i: (i, 0)),   # author_v tile (streamed)
                pl.BlockSpec((D, D), lambda i: (0, 0)),    # W_latent^T (resident)
                pl.BlockSpec((1, D), lambda i: (0, 0)),    # non-latent weight
            ],
            out_specs=pl.BlockSpec((1, TB), lambda i: (0, i)),  # lane-dense output
        ),
        compiler_params=pltpu.CompilerParams(
            dimension_semantics=("parallel",),
            vmem_limit_bytes=vmem_limit,
        ),
        cost_estimate=cost,
    )(x, author_v, w_latent_t, w_non_latent)

    # Back to the module's (B, 1) layout; padded tail positions are dropped.
    return out[0, :B][:, None]


if __name__ == "__main__":
    # Small shapes consistent with forward(x: (B, D), ids: (B,)) -> (B, 1)
    B, D = 8, 128

    key = jax.random.PRNGKey(0)
    kx, ka, kl, kn = jax.random.split(key, 4)

    x = jax.random.normal(kx, (B, D), dtype=jnp.float32)

    # TODO(synk): pandas author_vectors.loc[ids] lookup is a host-side gather;
    # here author_v is passed directly as the already-gathered (B, D) array.
    author_v = jax.random.normal(ka, (B, D), dtype=jnp.float32)

    # Deterministic init mimicking torch.nn.Linear defaults: U(-1/sqrt(D), 1/sqrt(D))
    bound = 1.0 / (D ** 0.5)
    w_latent = jax.random.uniform(
        kl, (D, D), dtype=jnp.float32, minval=-bound, maxval=bound
    )
    w_non_latent = jax.random.uniform(
        kn, (1, D), dtype=jnp.float32, minval=-bound, maxval=bound
    )

    # Transpose once at "model setup" time (hoisted out of the per-call path).
    w_latent_t = jnp.asarray(w_latent.T)

    out = btm_latent_forward(x, author_v, w_latent_t, w_non_latent)
    out = jax.block_until_ready(out)

    # Reference check against plain JAX (matches the PyTorch module with bias=False).
    ref = x @ w_non_latent.T + jnp.sum(
        author_v * (x @ w_latent.T), axis=1, keepdims=True
    )
    assert out.shape == (B, 1)
    assert jnp.allclose(out, ref, atol=1e-4, rtol=1e-4)

    print("KERNEL_OK")
</pallas_src>

<mosaic_0001>
module attributes {stable_mosaic.version = 11 : i64} {
  func.func @_btm_latent_kernel(%arg0: i32, %arg1: memref<8x128xf32, #tpu.memory_space<vmem>>, %arg2: memref<8x128xf32, #tpu.memory_space<vmem>>, %arg3: memref<128x128xf32, #tpu.memory_space<vmem>>, %arg4: memref<1x128xf32, #tpu.memory_space<vmem>>, %arg5: memref<1x8xf32, #tpu.memory_space<vmem>>) attributes {dimension_semantics = [#tpu.dimension_semantics<parallel>], iteration_bounds = array<i64: 1>, scalar_prefetch = 0 : i64, scratch_operands = 0 : i64, tpu.core_type = #tpu.core_type<tc>, window_params = [{transform_indices = @transform_0, window_bounds = array<i64: 8, 128>}, {transform_indices = @transform_1, window_bounds = array<i64: 8, 128>}, {pipeline_mode = #tpu.pipeline_mode<synchronous>, transform_indices = @transform_2, window_bounds = array<i64: 128, 128>}, {pipeline_mode = #tpu.pipeline_mode<synchronous>, transform_indices = @transform_3, window_bounds = array<i64: 1, 128>}, {transform_indices = @transform_4, window_bounds = array<i64: 1, 8>}]} {
    %c0 = arith.constant 0 : index
    %c0_0 = arith.constant 0 : index
    %0 = vector.load %arg1[%c0, %c0_0] : memref<8x128xf32, #tpu.memory_space<vmem>>, vector<8x128xf32>
    %c0_1 = arith.constant 0 : index
    %c0_2 = arith.constant 0 : index
    %1 = vector.load %arg2[%c0_1, %c0_2] : memref<8x128xf32, #tpu.memory_space<vmem>>, vector<8x128xf32>
    %c0_3 = arith.constant 0 : index
    %c0_4 = arith.constant 0 : index
    %2 = vector.load %arg3[%c0_3, %c0_4] : memref<128x128xf32, #tpu.memory_space<vmem>>, vector<128x128xf32>
    %cst = arith.constant dense<0.000000e+00> : vector<8x128xf32>
    %3 = tpu.matmul %0, %2, %cst {dimension_numbers = #tpu.dot_dimension_numbers<[1], [0], [0], [1], [0, 0, 1, 1], [], []>} : vector<8x128xf32>, vector<128x128xf32>, vector<8x128xf32> -> vector<8x128xf32>
    %4 = arith.mulf %1, %3 : vector<8x128xf32>
    %c0_5 = arith.constant 0 : index
    %c0_6 = arith.constant 0 : index
    %5 = vector.load %arg4[%c0_5, %c0_6] : memref<1x128xf32, #tpu.memory_space<vmem>>, vector<1x128xf32>
    %6 = vector.broadcast %5 : vector<1x128xf32> to vector<8x128xf32>
    %7 = arith.mulf %0, %6 : vector<8x128xf32>
    %8 = arith.addf %4, %7 : vector<8x128xf32>
    %cst_7 = arith.constant dense<0.000000e+00> : vector<8xf32>
    %9 = vector.multi_reduction <add>, %8, %cst_7 [1] : vector<8x128xf32> to vector<8xf32>
    %10 = vector.shape_cast %9 : vector<8xf32> to vector<1x8xf32>
    %c0_8 = arith.constant 0 : index
    %c0_9 = arith.constant 0 : index
    %11 = vector.load %arg5[%c0_8, %c0_9] : memref<1x8xf32, #tpu.memory_space<vmem>>, vector<1x8xf32>
    tpu.vector_store %arg5[%c0_8, %c0_9], %10 {strides = array<i32>} : memref<1x8xf32, #tpu.memory_space<vmem>>, vector<1x8xf32>,
    return
  }
  func.func @transform_0(%arg0: i32) -> (i32, i32) {
    %c0_i32 = arith.constant 0 : i32
    %c0_i32_0 = arith.constant 0 : i32
    return %arg0, %c0_i32 : i32, i32
  }
  func.func @transform_1(%arg0: i32) -> (i32, i32) {
    %c0_i32 = arith.constant 0 : i32
    %c0_i32_0 = arith.constant 0 : i32
    return %arg0, %c0_i32 : i32, i32
  }
  func.func @transform_2(%arg0: i32) -> (i32, i32) {
    %c0_i32 = arith.constant 0 : i32
    %c0_i32_0 = arith.constant 0 : i32
    %c0_i32_1 = arith.constant 0 : i32
    return %c0_i32, %c0_i32_0 : i32, i32
  }
  func.func @transform_3(%arg0: i32) -> (i32, i32) {
    %c0_i32 = arith.constant 0 : i32
    %c0_i32_0 = arith.constant 0 : i32
    %c0_i32_1 = arith.constant 0 : i32
    return %c0_i32, %c0_i32_0 : i32, i32
  }
  func.func @transform_4(%arg0: i32) -> (i32, i32) {
    %c0_i32 = arith.constant 0 : i32
    %c0_i32_0 = arith.constant 0 : i32
    return %c0_i32, %arg0 : i32, i32
  }
}

</mosaic_0001>

<bundles_post_ra>
// kernel: tpu_custom_call.1
= control target key start
LH: loop header
LB: loop body
LE: loop exit
PB: predicated region body
PF: predicated region fallthrough
CT: control target
= control target key end

     0   :  { %9 = vsyncpa [#allocation3], 0  ;;  %s376_s0 = inlined_call_operand.hbm [shape: f32[8,128], index: 0, kind: input, shape index: {}]   ;;  %s377_s1 = inlined_call_operand.hbm [shape: f32[8,128], index: 1, kind: input, shape index: {}]   ;;  %s378_s2 = inlined_call_operand.hbm [shape: f32[128,128], index: 2, kind: input, shape index: {}]   ;;  %s379_s3 = inlined_call_operand.vmem [shape: f32[1,128], index: 3, kind: input, shape index: {}]   ;;  %s380_s4 = inlined_call_operand.hbm [shape: f32[1,8], index: 4, kind: output, shape index: {}]  }
   0x1   :  { %10 = vsyncpa [#allocation6], 0 }
   0x2   :  { %11 = vsyncpa [#allocation4], 0  ;;  %s328_s15 = smov [#allocation5]   ;;  %s329_s17 = smov [#allocation2]  }
   0x3   :  { %s28_s16 = sshll.u32 %s328_s15, 4  ;;  %s18_s18 = sshll.u32 %s329_s17, 4  ;;  %s29_s16 = int_to_ptr.vmem [resolvable:$true] %s28_s16  ;;  %s19_s18 = int_to_ptr.vmem [resolvable:$true] %s18_s18 }
   0x4   :  { %s250_s19 = scalar_lea.vmem %s29_s16, 128  ;;  %p255_p1 = scmp.lt.s32.totalorder %s29_s16, %s29_s16 }
   0x5   :  { %p251_p0 = scmp.ne.s32.totalorder %s29_s16, %s250_s19  ;;  %p256_p2 = scmp.lt.s32.totalorder %s250_s19, %s250_s19 }
   0x7   :  { %p257_p3 = por %p256_p2, %p255_p1 }
   0x9   :  { %p258_p4 = pnand %p257_p3, %p251_p0 }
   0xb   :  { %261 = shalt.err (!%p258_p4)
}
   0xc   :  { %31 = dma.hbm_to_vmem [thread:$0]  %s377_s1, 128, %s29_s16, [#allocation6]  }
   0xd   :  { %s270_s22 = scalar_lea.vmem %s19_s18, 128  ;;  %p275_p6 = scmp.lt.s32.totalorder %s19_s18, %s19_s18 }
   0xe   :  { %p271_p5 = scmp.ne.s32.totalorder %s19_s18, %s270_s22  ;;  %p276_p7 = scmp.lt.s32.totalorder %s270_s22, %s270_s22 }
  0x10   :  { %p277_p8 = por %p276_p7, %p275_p6 }
  0x12   :  { %p278_p9 = pnand %p277_p8, %p271_p5 }
  0x14   :  { %281 = shalt.err (!%p278_p9)
}
  0x15   :  { %21 = dma.hbm_to_vmem [thread:$0]  %s376_s0, 128, %s19_s18, [#allocation3]  }
  0x16   :  { %s330_s25 = smov [#allocation7]  }
  0x17   :  { %s37_s26 = sshll.u32 %s330_s25, 4  ;;  %s38_s26 = int_to_ptr.vmem [resolvable:$true] %s37_s26 }
  0x18   :  { %s290_s27 = scalar_lea.vmem %s38_s26, 2048  ;;  %p295_p11 = scmp.lt.s32.totalorder %s38_s26, %s38_s26 }
  0x19   :  { %p291_p10 = scmp.ne.s32.totalorder %s38_s26, %s290_s27  ;;  %p296_p12 = scmp.lt.s32.totalorder %s290_s27, %s290_s27 }
  0x1b   :  { %p297_p13 = por %p296_p12, %p295_p11 }
  0x1d   :  { %p298_p0 = pnand %p297_p13, %p291_p10 }
  0x1f   :  { %301 = shalt.err (!%p298_p0)
}
  0x20   :  { %s331_s1 = smov 128   ;;  %s332_s28 = smov 8  }
  0x21   :  { %43 = dma.hbm_to_vmem [thread:$0]  %s378_s2, 2048, %s38_s26, [#allocation6], %s331_s1, %s331_s1, %s332_s28  }
  0x22   :  { %322 = dma.done.wait [#allocation3], 128  }
  0x23   :  { %323 = vsyncadd [#allocation3], 4294967168 }
  0x24   :  { %324 = dma.done.wait [#allocation6], 2176  }
  0x25   :  { %325 = vsyncadd [#allocation6], 4294965120  ;;  %v333_v0 = vmov 0.0   ;;  %vm334_vm0 = vmmov 0   ;;  %v72_v1 = vld [vmem:[#allocation7 + $0x78] sm:$0xff]  ;;  %v71_v2 = vld [vmem:[#allocation7 + $0x70] sm:$0xff]  ;;  %v156_v25 = vlaneseq }
  0x26   :  { %199 = vmatprep.subr.mxu0 %v333_v0  ;;  %231 = vmatprep.mubr.msk.f32.mxu0 %vm334_vm0, %v333_v0  ;;  %v70_v3 = vld [vmem:[#allocation7 + $0x68] sm:$0xff]  ;;  %v69_v4 = vld [vmem:[#allocation7 + $0x60] sm:$0xff]  ;;  %v68_v5 = vld [vmem:[#allocation7 + $0x58] sm:$0xff]  ;;  %s335_s5 = smov [#allocation8]   ;;  %vm163_vm1 = vcmask 57344  }
  0x27   :  { %200 = vmatpush3.msra.mxu0 %v72_v1  ;;  %v67_v6 = vld [vmem:[#allocation7 + $0x50] sm:$0xff]  ;;  %v66_v7 = vld [vmem:[#allocation7 + $0x48] sm:$0xff]  ;;  %v65_v8 = vld [vmem:[#allocation7 + $0x40] sm:$0xff]  ;;  %v157_v26 = vand.u32 127, %v156_v25  ;;  %v159_v27 = vshrl.u32 %v156_v25, 7  ;;  %s171_s6 = sshll.u32 %s335_s5, 4  ;;  %s172_s6 = int_to_ptr.vmem [resolvable:$true] %s171_s6 }
  0x28   :  { %201 = vmatprep.subr.mxu0 %v333_v0  ;;  %v64_v9 = vld [vmem:[#allocation7 + $0x38] sm:$0xff]  ;;  %v63_v10 = vld [vmem:[#allocation7 + $0x30] sm:$0xff]  ;;  %v62_v11 = vld [vmem:[#allocation7 + $0x28] sm:$0xff]  ;;  %s302_s7 = scalar_lea.vmem %s172_s6, 16  ;;  %p307_p2 = scmp.lt.s32.totalorder %s172_s6, %s172_s6 }
  0x29   :  { %202 = vmatpush3.msra.mxu0 %v71_v2  ;;  %v61_v12 = vld [vmem:[#allocation7 + $0x20] sm:$0xff]  ;;  %v60_v13 = vld [vmem:[#allocation7 + $0x18] sm:$0xff]  ;;  %v59_v14 = vld [vmem:[#allocation7 + $0x10] sm:$0xff]  ;;  %v160_v28 = vsub.s32 %v157_v26, %v159_v27  ;;  %p303_p1 = scmp.ne.s32.totalorder %s172_s6, %s302_s7 }
  0x2a   :  { %203 = vmatprep.subr.mxu0 %v333_v0  ;;  %v58_v15 = vld [vmem:[#allocation7 + $0x8] sm:$0xff]  ;;  %v57_v16 = vld [vmem:[#allocation7] sm:$0xff]  ;;  %v55_v17 = vld [vmem:[#allocation2] sm:$0xff] }
  0x2b   :  { %204 = vmatpush3.msra.mxu0 %v70_v3  ;;  %v181_v18 = vld [vmem:[%s379_s3] ss:$0 sm:$0xff]  ;;  %v56_v19 = vld [vmem:[#allocation5] sm:$0xff]  ;;  %s306_s3 = scalar_lea.vmem %s172_s6, 32 }
  0x2c   :  { %205 = vmatprep.subr.mxu0 %v333_v0  ;;  %v151_v20 = vmul.f32 %v181_v18, %v55_v17  ;;  %p308_p3 = scmp.lt.s32.totalorder %s306_s3, %s302_s7 }
  0x2d   :  { %206 = vmatpush3.msra.mxu0 %v69_v4 }
  0x2e   :  { %207 = vmatprep.subr.mxu0 %v333_v0  ;;  %p309_p4 = por %p308_p3, %p307_p2 }
  0x2f   :  { %208 = vmatpush3.msra.mxu0 %v68_v5 }
  0x30   :  { %209 = vmatprep.subr.mxu0 %v333_v0  ;;  %p310_p5 = pnand %p309_p4, %p303_p1 }
  0x31   :  { %210 = vmatpush3.msra.mxu0 %v67_v6 }
  0x32   :  { %211 = vmatprep.subr.mxu0 %v333_v0 }
  0x33   :  { %212 = vmatpush3.msra.mxu0 %v66_v7 }
  0x34   :  { %213 = vmatprep.subr.mxu0 %v333_v0 }
  0x35   :  { %214 = vmatpush3.msra.mxu0 %v65_v8 }
  0x36   :  { %215 = vmatprep.subr.mxu0 %v333_v0 }
  0x37   :  { %216 = vmatpush3.msra.mxu0 %v64_v9 }
  0x38   :  { %217 = vmatprep.subr.mxu0 %v333_v0 }
  0x39   :  { %218 = vmatpush3.msra.mxu0 %v63_v10 }
  0x3a   :  { %219 = vmatprep.subr.mxu0 %v333_v0 }
  0x3b   :  { %220 = vmatpush3.msra.mxu0 %v62_v11 }
  0x3c   :  { %221 = vmatprep.subr.mxu0 %v333_v0 }
  0x3d   :  { %222 = vmatpush3.msra.mxu0 %v61_v12 }
  0x3e   :  { %223 = vmatprep.subr.mxu0 %v333_v0 }
  0x3f   :  { %224 = vmatpush3.msra.mxu0 %v60_v13 }
  0x40   :  { %225 = vmatprep.subr.mxu0 %v333_v0 }
  0x41   :  { %226 = vmatpush3.msra.mxu0 %v59_v14 }
  0x42   :  { %227 = vmatprep.subr.mxu0 %v333_v0 }
  0x43   :  { %228 = vmatpush3.msra.mxu0 %v58_v15 }
  0x44   :  { %229 = vmatprep.subr.mxu0 %v333_v0 }
  0x45   :  { %230 = vmatpush3.msra.mxu0 %v57_v16 }
  0x46   :  { %232 = vmatmul.mubr.f32.vlgmr.msra.gmra.mxu0 %v55_v17 }
 0x106   :  { %v139_v21 = vpop.f32.mrf.mxu0 }
 0x107   :  { %v143_v22 = vmul.f32 %v139_v21, %v56_v19 }
 0x108   :  { %v233_v23 = vpop.f32.mrf.mxu0 }
 0x109   :  { %v152_v24 = vadd.f32 %v151_v20, %v143_v22 }
 0x10b   :  { %153 = vadd.xlane.f32.xlu0 %v152_v24 }
 0x194   :  { %v154_v29 = vpop.xlane.xlu0 %153 }
 0x195   :  { %v161_v30 = vrot.slane %v154_v29, %v160_v28 }
 0x197   :  { %164 = vst.msk [vmem:[#allocation8] sm:$0x1] %vm163_vm1, %v161_v30 }
 0x198   :  { %313 = shalt.err (!%p310_p5)
}
 0x199   :  { %174 = dma.vmem_to_hbm [thread:$0]  %s172_s6, 16, %s380_s4, [#allocation4]  }
 0x19a   :  { %326 = dma.done.wait [#allocation4], 16  }
 0x19b   :  { %327 = vsyncadd [#allocation4], 4294967280 }
 0x19c   :  { %178 = vsyncpa [#allocation3], 1 }
 0x19d   :  { %179 = vsyncpa [#allocation6], 1 }
 0x19e   :  { %180 = vsyncpa [#allocation4], 1 }

</bundles_post_ra>
